<compile_context>
chip_gen: v7x
topology: tpu7x:2x2x1
jax: 0.10.0
libtpu: 0.0.40
codegen_flags: <defaults>
</compile_context>

<pallas_src>
import jax
import jax.numpy as jnp
from jax.experimental import pallas as pl
from jax.experimental.pallas import tpu as pltpu


_LANE = 128
_MiB = 1024 * 1024


def _round_up(x, m):
    return (x + m - 1) // m * m


def _cdiv(a, b):
    return -(-a // b)


def _vmem_capacity_bytes():
    try:
        return int(pltpu.get_tpu_info().vmem_capacity_bytes)
    except Exception:
        return 64 * _MiB  # conservative fallback (v7x per-TensorCore VMEM)


def _emb_dot(onehot, d_block):
    # one-hot @ dictionary == embedding lookup.  For f32 dictionaries force a
    # full-f32 contraction so the lookup stays exact (bf16 truncation would
    # break the "exact lookup" semantics); bf16 dictionaries run a pure bf16
    # dot (one-hot 0/1 values are exactly representable in bf16).
    prec = jax.lax.Precision.HIGHEST if d_block.dtype == jnp.float32 else None
    return jnp.dot(onehot, d_block, preferred_element_type=jnp.float32,
                   precision=prec)


def _onehot_rows(x, dtype):
    tok = jnp.argmax(x, axis=-1)                              # first-max ties
    lane = jax.lax.broadcasted_iota(jnp.int32, x.shape, 1)    # (tm, Vp)
    return (lane == tok[:, None]).astype(dtype)


def _kernel_full_e(x_ref, d_ref, o_ref):
    # grid = (row_tiles,).  Dictionary block is grid-invariant -> DMA'd once
    # for the whole kernel; argmax/one-hot computed exactly once per row tile.
    onehot = _onehot_rows(x_ref[...], d_ref.dtype)
    o_ref[...] = _emb_dot(onehot, d_ref[...]).astype(o_ref.dtype)


def _kernel_tiled_e(x_ref, d_ref, o_ref, onehot_ref):
    # grid = (row_tiles, emb_tiles); emb axis innermost & "arbitrary".
    # argmax/one-hot computed once per row tile (at e == 0) and reused for all
    # emb tiles instead of re-running the XLU argmax + VPU compare per e step.
    @pl.when(pl.program_id(1) == 0)
    def _():
        onehot_ref[...] = _onehot_rows(x_ref[...], onehot_ref.dtype)

    o_ref[...] = _emb_dot(onehot_ref[...], d_ref[...]).astype(o_ref.dtype)


def one_hot_dictionary(x, dictionary, *, tm=1024, te=None):
    """x: (B, N, V) float; dictionary: (V, E) float -> (B, N, E)."""
    B, N, V = x.shape
    V2, E = dictionary.shape
    assert V == V2, "vocab_size mismatch between x and dictionary"
    out_dtype = dictionary.dtype

    # ---- lane padding: vocab with dtype-min (argmax unchanged), emb with 0 ----
    Vp = _round_up(V, _LANE)
    Ep = _round_up(E, _LANE)
    M = B * N
    x_flat = x.reshape(M, V)
    if jnp.issubdtype(x.dtype, jnp.floating):
        neg = jnp.finfo(x.dtype).min
    else:
        neg = jnp.iinfo(x.dtype).min
    if Vp != V:
        x_flat = jnp.pad(x_flat, ((0, 0), (0, Vp - V)), constant_values=neg)
    d = dictionary
    if Vp != V or Ep != E:
        d = jnp.pad(d, ((0, Vp - V), (0, Ep - E)))

    xb = jnp.dtype(x.dtype).itemsize
    db = jnp.dtype(out_dtype).itemsize

    capacity = _vmem_capacity_bytes()
    budget = int(capacity * 0.65)          # generation-aware working budget

    # Row-tile granularity: respect sub-32-bit sublane packing (bf16->16, i8->32).
    sub = max(8, 32 // xb, 32 // db)

    # ---- dictionary (emb) tiling ----------------------------------------------
    te_cap = Ep if te is None else min(max(_round_up(te, _LANE), _LANE), Ep)
    if te_cap == Ep and 2 * Vp * Ep * db <= budget // 2:
        te = Ep                            # grid-invariant dict: fetched once
    else:
        te = max((t for t in range(_LANE, te_cap + 1, _LANE)
                  if Ep % t == 0 and 2 * Vp * t * db <= budget // 2),
                 default=_LANE)
    e_tiled = te != Ep
    # TODO(synk): for vocabularies so large that even a (Vp, 128) dictionary block exceeds the budget, add a vocab-axis grid with a running argmax (or an argmax-then-gather path) instead of collapsing the row tile.

    def footprint(tm_):
        f = 2 * tm_ * Vp * xb              # x row tiles (double-buffered)
        f += 2 * Vp * te * db              # dictionary block (double-buffered;
                                           # single-buffering it would free
                                           # Vp*te*db more for larger tm)
        f += 2 * tm_ * te * db             # output tiles (double-buffered)
        # in-kernel temporaries: loaded x + iota, materialized one-hot,
        # f32 dot result before astype.
        f += tm_ * Vp * (xb + 4 + db) + tm_ * te * 4
        if e_tiled:
            f += tm_ * Vp * db             # persistent one-hot scratch
        return f

    # ---- row tiling -------------------------------------------------------------
    tm = min(tm, _round_up(M, sub))
    if M >= 2 * sub:                       # >= 2 row programs for megacore (v7x)
        tm = min(tm, _round_up(_cdiv(M, 2), sub))
    tm = max(sub, _round_up(tm, sub))
    while tm > sub and footprint(tm) > budget:
        tm = max(sub, _round_up(tm // 2, sub))
    # Balance row tiles so padding stays small and work splits evenly.
    nt = _cdiv(M, tm)
    tm = _round_up(_cdiv(M, nt), sub)
    # Prefer MXU-friendly (multiple-of-256) row tiles when the padding cost is small.
    if tm > 256:
        tm_r = _round_up(tm, 256)
        if (tm_r - tm) * 4 <= tm and footprint(tm_r) <= budget:
            tm = tm_r
    Mp = nt * tm
    if Mp != M:
        x_flat = jnp.pad(x_flat, ((0, Mp - M), (0, 0)), constant_values=neg)

    fp = footprint(tm)
    vmem_limit = int(min(max(fp + 16 * _MiB, 32 * _MiB), capacity - 8 * _MiB))

    # ---- grid / specs -----------------------------------------------------------
    if not e_tiled:
        grid = (nt,)
        in_specs = [pl.BlockSpec((tm, Vp), lambda i: (i, 0)),   # logits row tile
                    pl.BlockSpec((Vp, Ep), lambda i: (0, 0))]   # whole dictionary
        out_specs = pl.BlockSpec((tm, Ep), lambda i: (i, 0))
        scratch_shapes = []
        kernel = _kernel_full_e
        dim_sems = ("parallel",)
        dict_bytes = Vp * Ep * db                               # fetched once
    else:
        ne = Ep // te
        grid = (nt, ne)
        in_specs = [pl.BlockSpec((tm, Vp), lambda i, e: (i, 0)),
                    pl.BlockSpec((Vp, te), lambda i, e: (0, e))]
        out_specs = pl.BlockSpec((tm, te), lambda i, e: (i, e))
        scratch_shapes = [pltpu.VMEM((tm, Vp), out_dtype)]      # one-hot carry
        kernel = _kernel_tiled_e
        dim_sems = ("parallel", "arbitrary")
        dict_bytes = nt * Vp * Ep * db                          # re-streamed/row tile

    cost = pl.CostEstimate(
        flops=2 * Mp * Vp * Ep,
        transcendentals=0,
        bytes_accessed=Mp * Vp * xb + dict_bytes + Mp * Ep * db,
    )

    out_flat = pl.pallas_call(
        kernel,
        out_shape=jax.ShapeDtypeStruct((Mp, Ep), out_dtype),
        grid_spec=pltpu.PrefetchScalarGridSpec(
            num_scalar_prefetch=0,
            grid=grid,
            in_specs=in_specs,
            out_specs=out_specs,
            scratch_shapes=scratch_shapes,
        ),
        compiler_params=pltpu.CompilerParams(
            dimension_semantics=dim_sems,
            vmem_limit_bytes=vmem_limit,
        ),
        cost_estimate=cost,
    )(x_flat, d)

    return out_flat[:M, :E].reshape(B, N, E)


if __name__ == "__main__":
    # Module config: OneHotDictionary(vocab_size, emb_size)
    B, N, vocab_size, emb_size = 2, 8, 16, 32

    key = jax.random.PRNGKey(0)
    k_x, k_dict = jax.random.split(key)

    # Forward input: (B, N, vocab_size) scores/logits.
    x = jax.random.normal(k_x, (B, N, vocab_size), dtype=jnp.float32)
    # Deterministic "nn.Embedding(vocab_size, emb_size)" weights (N(0,1) init).
    dictionary = jax.random.normal(
        k_dict, (vocab_size, emb_size), dtype=jnp.float32
    )

    out = jax.block_until_ready(one_hot_dictionary(x, dictionary))

    # Pure-JAX reference: argmax + take (same as torch embedding lookup).
    tokens = jnp.argmax(x, axis=-1)
    ref = jnp.take(dictionary, tokens, axis=0)

    assert out.shape == (B, N, emb_size)
    assert jnp.allclose(out, ref, atol=1e-6), "mismatch vs reference"
    print("KERNEL_OK")
</pallas_src>

<mosaic_0001>
module attributes {stable_mosaic.version = 11 : i64} {
  func.func @_kernel_full_e(%arg0: i32, %arg1: memref<8x128xf32, #tpu.memory_space<vmem>>, %arg2: memref<128x128xf32, #tpu.memory_space<vmem>>, %arg3: memref<8x128xf32, #tpu.memory_space<vmem>>) attributes {dimension_semantics = [#tpu.dimension_semantics<parallel>], iteration_bounds = array<i64: 2>, scalar_prefetch = 0 : i64, scratch_operands = 0 : i64, tpu.core_type = #tpu.core_type<tc>, window_params = [{transform_indices = @transform_0, window_bounds = array<i64: 8, 128>}, {pipeline_mode = #tpu.pipeline_mode<synchronous>, transform_indices = @transform_1, window_bounds = array<i64: 128, 128>}, {transform_indices = @transform_2, window_bounds = array<i64: 8, 128>}]} {
    %c0 = arith.constant 0 : index
    %c0_0 = arith.constant 0 : index
    %0 = vector.load %arg1[%c0, %c0_0] : memref<8x128xf32, #tpu.memory_space<vmem>>, vector<8x128xf32>
    %1 = tpu.reduce_index %0 {axis = 1 : i32, kind = #tpu.reduction_kind<arg_max>} : vector<8x128xf32> -> vector<8xi32>
    %2 = tpu.iota {dimensions = array<i32: 1>} : vector<8x128xi32>
    %3 = vector.shape_cast %1 : vector<8xi32> to vector<8x1xi32>
    %4 = vector.broadcast %3 : vector<8x1xi32> to vector<8x128xi32>
    %5 = arith.cmpi eq, %2, %4 : vector<8x128xi32>
    %6 = arith.extui %5 : vector<8x128xi1> to vector<8x128xi32>
    %7 = arith.sitofp %6 : vector<8x128xi32> to vector<8x128xf32>
    %c0_1 = arith.constant 0 : index
    %c0_2 = arith.constant 0 : index
    %8 = vector.load %arg2[%c0_1, %c0_2] : memref<128x128xf32, #tpu.memory_space<vmem>>, vector<128x128xf32>
    %cst = arith.constant dense<0.000000e+00> : vector<8x128xf32>
    %9 = tpu.matmul %7, %8, %cst {dimension_numbers = #tpu.dot_dimension_numbers<[1], [0], [0], [1], [0, 0, 1, 1], [], []>, precision = #tpu.contract_precision<fp32>} : vector<8x128xf32>, vector<128x128xf32>, vector<8x128xf32> -> vector<8x128xf32>
    %c0_3 = arith.constant 0 : index
    %c0_4 = arith.constant 0 : index
    %10 = vector.load %arg3[%c0_3, %c0_4] : memref<8x128xf32, #tpu.memory_space<vmem>>, vector<8x128xf32>
    tpu.vector_store %arg3[%c0_3, %c0_4], %9 {strides = array<i32>} : memref<8x128xf32, #tpu.memory_space<vmem>>, vector<8x128xf32>,
    return
  }
  func.func @transform_0(%arg0: i32) -> (i32, i32) {
    %c0_i32 = arith.constant 0 : i32
    %c0_i32_0 = arith.constant 0 : i32
    return %arg0, %c0_i32 : i32, i32
  }
  func.func @transform_1(%arg0: i32) -> (i32, i32) {
    %c0_i32 = arith.constant 0 : i32
    %c0_i32_0 = arith.constant 0 : i32
    %c0_i32_1 = arith.constant 0 : i32
    return %c0_i32, %c0_i32_0 : i32, i32
  }
  func.func @transform_2(%arg0: i32) -> (i32, i32) {
    %c0_i32 = arith.constant 0 : i32
    %c0_i32_0 = arith.constant 0 : i32
    return %arg0, %c0_i32 : i32, i32
  }
}

</mosaic_0001>

<bundles_post_ra>
// kernel: tpu_custom_call.1
= control target key start
LH: loop header
LB: loop body
LE: loop exit
PB: predicated region body
PF: predicated region fallthrough
CT: control target
= control target key end

     0   :  { %7 = vsyncpa [#allocation3], 0  ;;  %s2090_s0 = inlined_call_operand.hbm [shape: f32[16,128], index: 0, kind: input, shape index: {}]   ;;  %s2091_s1 = inlined_call_operand.hbm [shape: f32[128,128], index: 1, kind: input, shape index: {}]   ;;  %s2092_s2 = inlined_call_operand.hbm [shape: f32[16,128], index: 2, kind: output, shape index: {}]  }
   0x1   :  { %9 = vsyncpa [#allocation3 + $0x1], 0 }
   0x2   :  { %10 = vsyncpa [#allocation6], 0 }
   0x3   :  { %11 = vsyncpa [#allocation4], 0 }
   0x4   :  { %13 = vsyncpa [#allocation4 + $0x1], 0  ;;  %s1634_s9 = smov 0   ;;  %s1636_s10 = smov 0  }
   0x5   :  { %s1638_s11 = smov 0   ;;  %s1640_s12 = smov 0  }
   0x6 LB: > { %s1655_s13 = sadd.s32 4294967295, %s1608_s12   ;;  %s934_s14 = sadd.s32 4294967294, %s1608_s12   ;;  %s1608_s12 = sphi %s1640_s12, %s2112_s12   ;;  %s1604_s11 = sphi %s1638_s11, %s2111_s11   ;;  %s1600_s10 = sphi %s1636_s10, %s2110_s10   ;;  %s1596_s9 = sphi %s1634_s9, %s2109_s9  }
   0x7   : > { %p39_p0 = scmp.ne.s32.totalorder %s1600_s10, %s1596_s9  ;;  %p2093_p1 = scmp.eq.s32.totalorder %s1655_s13, 0 }
   0x8   : > { %p90_p3 = scmp.eq.s32.totalorder %s934_s14, 1  ;;  %p935_p5 = scmp.ge.s32.totalorder %s1608_s12, 1 }
   0x9   : > { %p1664_p4 = por %p2093_p1, %p39_p0  ;;  %p97_p7 = scmp.lt.s32.totalorder %s1608_s12, 3 }
   0xa   : > { %p1669_p6 = por %p90_p3, %p39_p0  ;;  %s1610_s18 = smov [#allocation5]  }
   0xb   : > { %s2096_s15 = scalar_select %p1664_p4, 1, 0 }
   0xc   : > { %s2097_s16 = scalar_select %p1669_p6, 1, 0 }
   0xd   : > { %p1674_p8 = pnand %p935_p5, %p97_p7  ;;  %s109_s19 = sshll.u32 %s1610_s18, 4  ;;  %s1678_s19 = int_to_ptr.vmem [resolvable:$true] %s109_s19 }
   0xe   : > { %s1690_s21 = sadd.s32 1, %s1608_s12   ;;  %s26_s22 = sadd.s32 1, %s1604_s11 }
   0xf   : > { %s2098_s17 = scalar_select %p1674_p8, 1, 0 }
  0x10   : > { %p1425_p9 = pneg %p1674_p8  ;;  %s23_s23 = ssub.s32 %s1608_s12, %s1690_s21 }
  0x11   : > { %s1480_s26 = scalar_lea.hbm %s2091_s1, 2048 }
  0x12   : > { %p1685_p11 = pnand %p1425_p9, %p2093_p1  ;;  %p1481_p12 = scmp.ne.s32.totalorder %s2091_s1, %s1480_s26 }
  0x13   : > { %p1487_p5 = scmp.lt.u32.totalorder %s1480_s26, %s2091_s1 }
  0x14   : > { %p1482_p13 = pneg %p1685_p11 }
  0x16   : > { %p1483_p0 = pnand %p1482_p13, %p1481_p12 }
  0x18   : > { %p1484_p3 = pneg %p1483_p0 }
  0x1a   : > { %p1489_p7 = pnand %p1487_p5, %p1484_p3 }
  0x1c   : > { %1492 = shalt.err (!%p1489_p7)
}
  0x1d   : > { %s1493_s3 = scalar_lea.vmem %s1678_s19, 2048  ;;  %p1501_p2 = scmp.lt.s32.totalorder %s1678_s19, %s1678_s19 }
  0x1e   : > { %p1494_p9 = scmp.ne.s32.totalorder %s1678_s19, %s1493_s3  ;;  %p1502_p6 = scmp.lt.s32.totalorder %s1493_s3, %s1493_s3 }
  0x20   : > { %p1496_p10 = pnand %p1494_p9, %p1482_p13  ;;  %p1503_p4 = por %p1502_p6, %p1501_p2 }
  0x22   : > { %p1497_p1 = pneg %p1496_p10 }
  0x24   : > { %p1504_p8 = pnand %p1503_p4, %p1497_p1 }
  0x26   : > { %1507 = shalt.err (!%p1504_p8)
}
  0x27   : > { %s1611_s4 = smov 128   ;;  %s1612_s5 = smov 8  }
  0x28   : > { %1428 = dma.hbm_to_vmem [thread:$0]  (!%p1685_p11), %s2091_s1, 2048, %s1678_s19, [#allocation6], %s1611_s4, %s1611_s4, %s1612_s5  }
  0x29   : > { %p24_p2 = scmp.eq.s32.totalorder %s23_s23, 0  ;;  %p33_p1 = scmp.ne.s32.totalorder %s1604_s11, %s1600_s10 }
  0x2a   : > { %p34_p4 = scmp.eq.s32.totalorder %s1608_s12, 0  ;;  %p1438_p6 = scmp.lt.s32.totalorder %s1608_s12, 2 }
  0x2b   : > { %s1721_s8 = scalar_select %p24_p2, %s1604_s11, %s26_s22  }
  0x2c   : > { %p35_p8 = por %p34_p4, %p33_p1  ;;  %p2100_p10 = scmp.eq.s32.totalorder %s1655_s13, 1 }
  0x2d   : > { %s123_s18 = sand.u32 1, %s1604_s11   ;;  %s939_s24 = sshll.u32 %s1608_s12, 7 }
  0x2e   : > { %p1725_p12 = por %p2100_p10, %p33_p1  ;;  %s938_s25 = sshll.u32 %s123_s18, 3 }
  0x2f   : > { %s1734_s27 = scalar_lea.hbm %s2090_s0, %s939_s24  ;;  %s127_s19 = scalar_lea.vmem [#allocation2], %s938_s25 }
  0x30   : > { %s134_s22 = sshll.u32 %s127_s19, 4  ;;  %p1736_p11 = pnand %p1438_p6, %p35_p8  ;;  %s1740_s22 = int_to_ptr.vmem [resolvable:$true] %s134_s22 }
  0x31   : > { %s124_s28 = scalar_lea.sflag [#allocation3], %s123_s18  ;;  %s1508_s29 = scalar_lea.hbm %s1734_s27, 128 }
  0x32   : > { %p1509_p13 = scmp.ne.s32.totalorder %s1734_s27, %s1508_s29  ;;  %p1510_p0 = pneg %p1736_p11 }
  0x33   : > { %s1513_s4 = scalar_lea.hbm %s2090_s0, 256  ;;  %p1514_p7 = scmp.lt.u32.totalorder %s1734_s27, %s2090_s0 }
  0x34   : > { %p1511_p3 = pnand %p1510_p0, %p1509_p13  ;;  %p1515_p9 = scmp.lt.u32.totalorder %s1513_s4, %s1508_s29 }
  0x35   : > { %p1517_p1 = scmp.lt.u32.totalorder %s1508_s29, %s1734_s27 }
  0x36   : > { %p1512_p5 = pneg %p1511_p3  ;;  %p1516_p2 = por %p1515_p9, %p1514_p7 }
  0x38   : > { %p1518_p4 = por %p1517_p1, %p1516_p2 }
  0x3a   : > { %p1519_p6 = pnand %p1518_p4, %p1512_p5 }
  0x3c   : > { %1522 = shalt.err (!%p1519_p6)
}
  0x3d   : > { %s1523_s7 = scalar_lea.vmem %s1740_s22, 128  ;;  %s1613_s18 = smov [#allocation2]  }
  0x3e   : > { %p1524_p8 = scmp.ne.s32.totalorder %s1740_s22, %s1523_s7  ;;  %s1528_s24 = sshll.u32 %s1613_s18, 4  ;;  %s1529_s24 = int_to_ptr.vmem [resolvable:$false] %s1528_s24 }
  0x3f   : > { %s1530_s25 = scalar_lea.vmem %s1529_s24, 256  ;;  %p1531_p3 = scmp.lt.s32.totalorder %s1740_s22, %s1529_s24 }
  0x40   : > { %p1526_p10 = pnand %p1524_p8, %p1510_p0  ;;  %p1532_p7 = scmp.lt.s32.totalorder %s1530_s25, %s1523_s7 }
  0x42   : > { %p1527_p13 = pneg %p1526_p10  ;;  %p1533_p9 = por %p1532_p7, %p1531_p3 }
  0x44   : > { %p1534_p2 = pnand %p1533_p9, %p1527_p13 }
  0x46   : > { %1537 = shalt.err (!%p1534_p2)
}
  0x47   : > { %1432 = dma.hbm_to_vmem [thread:$0]  (!%p1736_p11), %s1734_s27, 128, %s1740_s22, %s124_s28  }
  0x48   : > { %p2103_p5 = scmp.ne.s32.totalorder %s2098_s17, 0 }
  0x49   : > { %s1770_s20 = sand.u32 (!%p2103_p5), 1, %s1600_s10   ;;  %p2104_p0 = scmp.ne.s32.totalorder (!%p2103_p5), %s2096_s15, 0 }
  0x4a   : > { %143 = sbr.rel (%p2103_p5) target bundleno = 531 (0x213), region = 28  ;;  %s941_s26 = sshll.u32 (!%p2103_p5), %s1770_s20, 3 }
  0x4b   : > { %s146_s19 = scalar_lea.sflag (!%p2103_p5), [#allocation3], %s1770_s20  ;;  %s149_s29 = scalar_lea.vmem (!%p2103_p5), [#allocation2], %s941_s26 }
  0x51   : > { %1583 = dma.done.wait (%p2104_p0), %s146_s19, 128  }
  0x52   : > { %1585 = vsyncadd (%p2104_p0), %s146_s19, 4294967168  ;;  %p2105_p11 = scmp.eq.s32.totalorder %s1655_s13, 0 }
  0x54   : > { %1587 = dma.done.wait (%p2105_p11), [#allocation6], 2048   ;;  %p2106_p1 = pmov %p2105_p11 }
  0x55   : > { %v1614_v0 = vmov 0.0|0.0   ;;  %v174_v1 = vld [vmem:[%s149_s29] sm:$0xff]  ;;  %v182_v2 = vld [vmem:[#allocation5] sm:$0xff]  ;;  %v183_v3 = vld [vmem:[#allocation5 + $0x8] sm:$0xff]  ;;  %vm1615_vm0 = vmmov 0   ;;  %v1616_v57 = vmov 0.0  }
  0x56   : > { %1589 = vsyncadd (%p2106_p1), [#allocation6], 4294965248  ;;  %1336 = vmatprep.subr.bf16.mxu0 %v1614_v0  ;;  %1264 = vmatprep.subr.bf16.mxu1 %v1614_v0  ;;  %v199_v4 = vand.u32 4294901760, %v182_v2  ;;  %v202_v5 = vand.u32 4294901760, %v183_v3  ;;  %v184_v6 = vld [vmem:[#allocation5 + $0x10] sm:$0xff]  ;;  %v185_v7 = vld [vmem:[#allocation5 + $0x18] sm:$0xff] }
  0x57   : > { %175 = vmax.index.xlane.f32.xlu0 %v174_v1  ;;  %v186_v8 = vld [vmem:[#allocation5 + $0x20] sm:$0xff]  ;;  %v205_v9 = vand.u32 4294901760, %v184_v6  ;;  %v208_v10 = vand.u32 4294901760, %v185_v7  ;;  %v187_v11 = vld [vmem:[#allocation5 + $0x28] sm:$0xff]  ;;  %v188_v13 = vld [vmem:[#allocation5 + $0x30] sm:$0xff]  ;;  %1191 = vmatprep.mubr.msk.f32.mxu0 %vm1615_vm0, %v1616_v57  ;;  %s949_s15 = sshll.u32 %s1655_s13, 7 }
  0x58   : > { %v211_v12 = vand.u32 4294901760, %v186_v8  ;;  %v189_v14 = vld [vmem:[#allocation5 + $0x38] sm:$0xff]  ;;  %v1786_v15 = vpack.c.bf16 %v202_v5, %v199_v4  ;;  %v1788_v16 = vsub.f32 %v182_v2, %v199_v4  ;;  %v1790_v17 = vsub.f32 %v183_v3, %v202_v5  ;;  %v190_v19 = vld [vmem:[#allocation5 + $0x40] sm:$0xff]  ;;  %v191_v20 = vld [vmem:[#allocation5 + $0x48] sm:$0xff]  ;;  %1086 = vmatprep.mubr.msk.f32.mxu1 %vm1615_vm0, %v1616_v57  ;;  %s173_s17 = scalar_lea.vmem [#allocation7], %s941_s26  ;;  %s2046_s28 = scalar_lea.hbm %s2092_s2, %s949_s15 }
  0x59   : > { %v214_v18 = vand.u32 4294901760, %v187_v11  ;;  %v192_v21 = vld [vmem:[#allocation5 + $0x50] sm:$0xff]  ;;  %v1792_v22 = vsub.f32 %v184_v6, %v205_v9  ;;  %v1794_v23 = vsub.f32 %v185_v7, %v208_v10  ;;  %v193_v25 = vld [vmem:[#allocation5 + $0x58] sm:$0xff]  ;;  %v1798_v26 = vld [vmem:[#allocation5 + $0x60] sm:$0xff]  ;;  %v1802_v27 = vpack.c.bf16 %v208_v10, %v205_v9  ;;  %s854_s27 = sshll.u32 %s173_s17, 4  ;;  %s841_s30 = scalar_lea.sflag [#allocation4], %s1770_s20  ;;  %s2048_s27 = int_to_ptr.vmem [resolvable:$true] %s854_s27 }
  0x5a   : > { %v1796_v24 = vsub.f32 %v186_v8, %v211_v12  ;;  %1338 = vmatpush3.bf16.msra.mxu0 %v1786_v15  ;;  %1266 = vmatpush3.bf16.msra.mxu1 %v1786_v15  ;;  %v217_v29 = vand.u32 4294901760, %v188_v13  ;;  %v220_v30 = vand.u32 4294901760, %v189_v14  ;;  %v223_v31 = vand.u32 4294901760, %v190_v19  ;;  %v195_v34 = vld [vmem:[#allocation5 + $0x68] sm:$0xff]  ;;  %v196_v47 = vld [vmem:[#allocation5 + $0x70] sm:$0xff]  ;;  %v197_v48 = vld [vmem:[#allocation5 + $0x78] sm:$0xff] }
  0x5b   : > { %v1804_v28 = vsub.f32 %v187_v11, %v214_v18  ;;  %1339 = vmatprep.subr.bf16.mxu0 %v1614_v0  ;;  %1267 = vmatprep.subr.bf16.mxu1 %v1614_v0  ;;  %v226_v32 = vand.u32 4294901760, %v191_v20  ;;  %v229_v33 = vand.u32 4294901760, %v192_v21  ;;  %v232_v37 = vand.u32 4294901760, %v193_v25  ;;  %s1538_s3 = scalar_lea.vmem %s2048_s27, 128  ;;  %s1618_s13 = smov [#allocation7]  }
  0x5c   : > { %v1808_v35 = vsub.f32 %v188_v13, %v217_v29  ;;  %v1810_v36 = vsub.f32 %v189_v14, %v220_v30  ;;  %v235_v38 = vand.u32 4294901760, %v1798_v26  ;;  %v1813_v39 = vpack.c.bf16 %v214_v18, %v211_v12  ;;  %p1539_p4 = scmp.ne.s32.totalorder %s2048_s27, %s1538_s3  ;;  %s1542_s4 = sshll.u32 %s1618_s13, 4  ;;  %s1543_s4 = int_to_ptr.vmem [resolvable:$false] %s1542_s4 }
  0x5d   : > { %v1815_v40 = vsub.f32 %v190_v19, %v223_v31  ;;  %v1817_v41 = vsub.f32 %v191_v20, %v226_v32  ;;  %v1821_v42 = vsub.f32 %v192_v21, %v229_v33  ;;  %v1823_v43 = vsub.f32 %v193_v25, %v232_v37  ;;  %s1544_s5 = scalar_lea.vmem %s1543_s4, 256  ;;  %p1545_p10 = scmp.lt.s32.totalorder %s2048_s27, %s1543_s4 }
  0x5e   : > { %1341 = vmatpush3.bf16.msra.mxu0 %v1802_v27  ;;  %1269 = vmatpush3.bf16.msra.mxu1 %v1802_v27  ;;  %v238_v44 = vand.u32 4294901760, %v195_v34  ;;  %v1826_v45 = vsub.f32 %v1798_v26, %v235_v38  ;;  %v1834_v49 = vpack.c.bf16 %v220_v30, %v217_v29  ;;  %v241_v50 = vand.u32 4294901760, %v196_v47  ;;  %p1540_p6 = pnand %p1539_p4, %p1725_p12  ;;  %p1546_p13 = scmp.lt.s32.totalorder %s1544_s5, %s1538_s3 }
  0x5f   : > { %1342 = vmatprep.subr.bf16.mxu0 %v1614_v0  ;;  %1270 = vmatprep.subr.bf16.mxu1 %v1614_v0  ;;  %v244_v51 = vand.u32 4294901760, %v197_v48  ;;  %v1838_v52 = vpack.c.bf16 %v226_v32, %v223_v31  ;;  %v292_v55 = vand.u32 4294901760, %v1788_v16  ;;  %v299_v56 = vand.u32 4294901760, %v1790_v17 }
  0x60   : > { %v1830_v46 = vsub.f32 %v195_v34, %v238_v44  ;;  %v1842_v53 = vsub.f32 %v196_v47, %v241_v50  ;;  %v1860_v61 = vpack.c.bf16 %v232_v37, %v229_v33  ;;  %v306_v1 = vand.u32 4294901760, %v1792_v22  ;;  %p1541_p8 = pneg %p1540_p6  ;;  %p1547_p3 = por %p1546_p13, %p1545_p10 }
  0x61   : > { %v1844_v54 = vsub.f32 %v197_v48, %v244_v51  ;;  %v1854_v58 = vpack.c.bf16 %v299_v56, %v292_v55  ;;  %v293_v59 = vsub.f32 %v1788_v16, %v292_v55  ;;  %v300_v60 = vsub.f32 %v1790_v17, %v299_v56 }
  0x62   : > { %1344 = vmatpush3.bf16.msra.mxu0 %v1813_v39  ;;  %1272 = vmatpush3.bf16.msra.mxu1 %v1813_v39  ;;  %v313_v2 = vand.u32 4294901760, %v1794_v23  ;;  %v307_v5 = vsub.f32 %v1792_v22, %v306_v1  ;;  %v1874_v7 = vpack.c.bf16 %v238_v44, %v235_v38  ;;  %v320_v10 = vand.u32 4294901760, %v1796_v24  ;;  %p1548_p7 = pnand %p1547_p3, %p1541_p8 }
  0x63   : > { %1345 = vmatprep.subr.bf16.mxu0 %v1614_v0  ;;  %1273 = vmatprep.subr.bf16.mxu1 %v1614_v0  ;;  %v294_v62 = vand.u32 4294901760, %v293_v59  ;;  %v301_v63 = vand.u32 4294901760, %v300_v60  ;;  %v327_v11 = vand.u32 4294901760, %v1804_v28  ;;  %v1888_v19 = vpack.c.bf16 %v244_v51, %v241_v50 }
  0x64   : > { %v1868_v4 = vpack.c.bf16 %v313_v2, %v306_v1  ;;  %v314_v6 = vsub.f32 %v1794_v23, %v313_v2  ;;  %v308_v8 = vand.u32 4294901760, %v307_v5  ;;  %v321_v14 = vsub.f32 %v1796_v24, %v320_v10 }
  0x65   : > { %v1866_v3 = vpack.c.bf16 %v301_v63, %v294_v62  ;;  %v1882_v13 = vpack.c.bf16 %v327_v11, %v320_v10  ;;  %v328_v18 = vsub.f32 %v1804_v28, %v327_v11  ;;  %v334_v25 = vand.u32 4294901760, %v1808_v35 }
  0x66   : > { %1347 = vmatpush3.bf16.msra.mxu0 %v1834_v49  ;;  %1275 = vmatpush3.bf16.msra.mxu1 %v1834_v49  ;;  %v315_v9 = vand.u32 4294901760, %v314_v6  ;;  %v322_v20 = vand.u32 4294901760, %v321_v14  ;;  %v341_v26 = vand.u32 4294901760, %v1810_v36  ;;  %v348_v37 = vand.u32 4294901760, %v1815_v40 }
  0x67   : > { %1348 = vmatprep.subr.bf16.mxu0 %v1614_v0  ;;  %1276 = vmatprep.subr.bf16.mxu1 %v1614_v0  ;;  %v329_v21 = vand.u32 4294901760, %v328_v18  ;;  %v335_v31 = vsub.f32 %v1808_v35, %v334_v25  ;;  %v355_v38 = vand.u32 4294901760, %v1817_v41  ;;  %v362_v56 = vand.u32 4294901760, %v1821_v42 }
  0x68   : > { %v1880_v12 = vpack.c.bf16 %v315_v9, %v308_v8  ;;  %v1896_v30 = vpack.c.bf16 %v341_v26, %v334_v25  ;;  %v342_v32 = vsub.f32 %v1810_v36, %v341_v26  ;;  %v349_v48 = vsub.f32 %v1815_v40, %v348_v37 }
  0x69   : > { %v1894_v29 = vpack.c.bf16 %v329_v21, %v322_v20  ;;  %v336_v33 = vand.u32 4294901760, %v335_v31  ;;  %v1908_v47 = vpack.c.bf16 %v355_v38, %v348_v37  ;;  %v356_v50 = vsub.f32 %v1817_v41, %v355_v38 }
  0x6a   : > { %1350 = vmatpush3.bf16.msra.mxu0 %v1838_v52  ;;  %1278 = vmatpush3.bf16.msra.mxu1 %v1838_v52  ;;  %v343_v34 = vand.u32 4294901760, %v342_v32  ;;  %v350_v51 = vand.u32 4294901760, %v349_v48  ;;  %v369_v59 = vand.u32 4294901760, %v1823_v43  ;;  %v363_v63 = vsub.f32 %v1821_v42, %v362_v56 }
  0x6b   : > { %1351 = vmatprep.subr.bf16.mxu0 %v1614_v0  ;;  %1279 = vmatprep.subr.bf16.mxu1 %v1614_v0  ;;  %v357_v55 = vand.u32 4294901760, %v356_v50  ;;  %v376_v6 = vand.u32 4294901760, %v1826_v45  ;;  %v383_v8 = vand.u32 4294901760, %v1830_v46  ;;  %v390_v21 = vand.u32 4294901760, %v1842_v53 }
  0x6c   : > { %v1906_v44 = vpack.c.bf16 %v343_v34, %v336_v33  ;;  %v1376_v62 = vpack.c.bf16 %v369_v59, %v362_v56  ;;  %v370_v1 = vsub.f32 %v1823_v43, %v369_v59  ;;  %v364_v2 = vand.u32 4294901760, %v363_v63 }
  0x6d   : > { %v1301_v60 = vpack.c.bf16 %v357_v55, %v350_v51  ;;  %v1379_v10 = vpack.c.bf16 %v383_v8, %v376_v6  ;;  %v377_v11 = vsub.f32 %v1826_v45, %v376_v6  ;;  %v384_v14 = vsub.f32 %v1830_v46, %v383_v8 }
  0x6e   : > { %1353 = vmatpush3.bf16.msra.mxu0 %v1860_v61  ;;  %1281 = vmatpush3.bf16.msra.mxu1 %v1860_v61  ;;  %v371_v5 = vand.u32 4294901760, %v370_v1  ;;  %v397_v25 = vand.u32 4294901760, %v1844_v54  ;;  %v391_v32 = vsub.f32 %v1842_v53, %v390_v21  ;;  %v1313_v48 = vpack.c.bf16 %v1790_v17, %v1788_v16 }
  0x6f   : > { %1354 = vmatprep.subr.bf16.mxu0 %v1614_v0  ;;  %1282 = vmatprep.subr.bf16.mxu1 %v1614_v0  ;;  %v378_v18 = vand.u32 4294901760, %v377_v11  ;;  %v385_v20 = vand.u32 4294901760, %v384_v14  ;;  %v1316_v50 = vpack.c.bf16 %v1794_v23, %v1792_v22  ;;  %v1319_v51 = vpack.c.bf16 %v1804_v28, %v1796_v24 }
  0x70   : > { %v1304_v9 = vpack.c.bf16 %v371_v5, %v364_v2  ;;  %v1382_v31 = vpack.c.bf16 %v397_v25, %v390_v21  ;;  %v398_v33 = vsub.f32 %v1844_v54, %v397_v25  ;;  %v392_v34 = vand.u32 4294901760, %v391_v32 }
  0x71   : > { %v1307_v26 = vpack.c.bf16 %v385_v20, %v378_v18  ;;  %v1322_v55 = vpack.c.bf16 %v1810_v36, %v1808_v35  ;;  %v1325_v56 = vpack.c.bf16 %v1817_v41, %v1815_v40  ;;  %v1328_v59 = vpack.c.bf16 %v1823_v43, %v1821_v42 }
  0x72   : > { %1356 = vmatpush3.bf16.msra.mxu0 %v1874_v7  ;;  %1284 = vmatpush3.bf16.msra.mxu1 %v1874_v7  ;;  %v399_v37 = vand.u32 4294901760, %v398_v33  ;;  %v1331_v63 = vpack.c.bf16 %v1830_v46, %v1826_v45  ;;  %v1334_v16 = vpack.c.bf16 %v1844_v54, %v1842_v53  ;;  %v177_v17 = vlaneseq }
  0x73   : > { %1357 = vmatprep.subr.bf16.mxu0 %v1614_v0  ;;  %1285 = vmatprep.subr.bf16.mxu1 %v1614_v0 }
  0x74   : > { %v1310_v38 = vpack.c.bf16 %v399_v37, %v392_v34  ;;  %v1940_v1 = vand.u32 127, %v177_v17 }
  0x76   : > { %1359 = vmatpush3.bf16.msra.mxu0 %v1888_v19  ;;  %1287 = vmatpush3.bf16.msra.mxu1 %v1888_v19 }
  0x77   : > { %1360 = vmatprep.subr.bf16.mxu0 %v1614_v0  ;;  %1288 = vmatprep.subr.bf16.mxu1 %v1614_v0 }
  0xe4   : > { %v1942_v2 = vpop.xlane.xlu0 %175 }
  0xe5   : > { %vm179_vm1 = vcmp.eq.s32.totalorder %v1940_v1, %v1942_v2 }
  0xe6   : > { %v944_v5 = vsel %vm179_vm1, 1.0, %v1616_v57 }
  0xe7   : > { %v1950_v6 = vsub.f32 %v944_v5, %v944_v5 }
  0xe9   : > { %v281_v8 = vand.u32 4294901760, %v1950_v6 }
  0xeb   : > { %1192 = vmatmul.mubr.f32.vlgmr.msra.gmra.mrb[0].mxu0 %v281_v8  ;;  %v282_v11 = vsub.f32 %v1950_v6, %v281_v8 }
  0xec   : > { %1362 = vmatpush3.bf16.msra.mxu0 %v1854_v58  ;;  %1226 = vmatprep.mubr.msk.f32.mxu0 %vm1615_vm0, %v1616_v57  ;;  %v1617_v58 = vmov 1.0  }
  0xed   : > { %1363 = vmatprep.subr.bf16.mxu0 %v1614_v0  ;;  %v283_v14 = vand.u32 4294901760, %v282_v11 }
  0xef   : > { %1087 = vmatmul.mubr.f32.vlgmr.msra.gmra.mrb[0].mxu1 %v283_v14 }
  0xf0   : > { %1290 = vmatpush3.bf16.msra.mxu1 %v1866_v3  ;;  %1365 = vmatpush3.bf16.msra.mxu0 %v1868_v4 }
  0xf1   : > { %1291 = vmatprep.subr.bf16.mxu1 %v1614_v0  ;;  %1366 = vmatprep.subr.bf16.mxu0 %v1614_v0 }
  0xf2   : > { %1121 = vmatprep.mubr.msk.f32.mxu1 %vm1615_vm0, %v1616_v57 }
  0xf4   : > { %1293 = vmatpush3.bf16.msra.mxu1 %v1880_v12  ;;  %1368 = vmatpush3.bf16.msra.mxu0 %v1882_v13 }
  0xf5   : > { %1294 = vmatprep.subr.bf16.mxu1 %v1614_v0  ;;  %1369 = vmatprep.subr.bf16.mxu0 %v1614_v0 }
  0xf8   : > { %1296 = vmatpush3.bf16.msra.mxu1 %v1894_v29  ;;  %1371 = vmatpush3.bf16.msra.mxu0 %v1896_v30 }
  0xf9   : > { %1297 = vmatprep.subr.bf16.mxu1 %v1614_v0  ;;  %1372 = vmatprep.subr.bf16.mxu0 %v1614_v0 }
  0xfc   : > { %1299 = vmatpush3.bf16.msra.mxu1 %v1906_v44  ;;  %1374 = vmatpush3.bf16.msra.mxu0 %v1908_v47 }
  0xfd   : > { %1300 = vmatprep.subr.bf16.mxu1 %v1614_v0  ;;  %1375 = vmatprep.subr.bf16.mxu0 %v1614_v0 }
 0x100   : > { %1302 = vmatpush3.bf16.msra.mxu1 %v1301_v60  ;;  %1377 = vmatpush3.bf16.msra.mxu0 %v1376_v62 }
 0x101   : > { %1303 = vmatprep.subr.bf16.mxu1 %v1614_v0  ;;  %1378 = vmatprep.subr.bf16.mxu0 %v1614_v0 }
 0x104   : > { %1305 = vmatpush3.bf16.msra.mxu1 %v1304_v9  ;;  %1380 = vmatpush3.bf16.msra.mxu0 %v1379_v10 }
 0x105   : > { %1306 = vmatprep.subr.bf16.mxu1 %v1614_v0  ;;  %1381 = vmatprep.subr.bf16.mxu0 %v1614_v0 }
 0x108   : > { %1308 = vmatpush3.bf16.msra.mxu1 %v1307_v26  ;;  %1383 = vmatpush3.bf16.msra.mxu0 %v1382_v31 }
 0x109   : > { %1309 = vmatprep.subr.bf16.mxu1 %v1614_v0  ;;  %1384 = vmatprep.subr.bf16.mxu0 %v1614_v0 }
 0x10b   : > { %1227 = vmatmul.mubr.msk.f32.vlgmr.msra.gmra.mrb[0].mxu0 %vm179_vm1, %v1617_v58 }
 0x10c   : > { %1311 = vmatpush3.bf16.msra.mxu1 %v1310_v38  ;;  %1386 = vmatpush3.bf16.msra.mxu0 %v1786_v15 }
 0x10d   : > { %1312 = vmatprep.subr.bf16.mxu1 %v1614_v0  ;;  %1387 = vmatprep.subr.bf16.mxu0 %v1614_v0 }
 0x10e   : > { %1261 = vmatprep.mubr.msk.f32.mxu0 %vm1615_vm0, %v1616_v57 }
 0x10f   : > { %1122 = vmatmul.mubr.msk.f32.vlgmr.msra.gmra.mrb[0].mxu1 %vm179_vm1, %v1617_v58 }
 0x110   : > { %1314 = vmatpush3.bf16.msra.mxu1 %v1313_v48  ;;  %1389 = vmatpush3.bf16.msra.mxu0 %v1802_v27 }
 0x111   : > { %1315 = vmatprep.subr.bf16.mxu1 %v1614_v0  ;;  %1390 = vmatprep.subr.bf16.mxu0 %v1614_v0 }
 0x112   : > { %1156 = vmatprep.mubr.msk.f32.mxu1 %vm1615_vm0, %v1616_v57 }
 0x114   : > { %1317 = vmatpush3.bf16.msra.mxu1 %v1316_v50  ;;  %1392 = vmatpush3.bf16.msra.mxu0 %v1813_v39 }
 0x115   : > { %1318 = vmatprep.subr.bf16.mxu1 %v1614_v0  ;;  %1393 = vmatprep.subr.bf16.mxu0 %v1614_v0 }
 0x118   : > { %1320 = vmatpush3.bf16.msra.mxu1 %v1319_v51  ;;  %1395 = vmatpush3.bf16.msra.mxu0 %v1834_v49 }
 0x119   : > { %1321 = vmatprep.subr.bf16.mxu1 %v1614_v0  ;;  %1396 = vmatprep.subr.bf16.mxu0 %v1614_v0 }
 0x11c   : > { %1323 = vmatpush3.bf16.msra.mxu1 %v1322_v55  ;;  %1398 = vmatpush3.bf16.msra.mxu0 %v1838_v52 }
 0x11d   : > { %1324 = vmatprep.subr.bf16.mxu1 %v1614_v0  ;;  %1399 = vmatprep.subr.bf16.mxu0 %v1614_v0 }
 0x120   : > { %1326 = vmatpush3.bf16.msra.mxu1 %v1325_v56  ;;  %1401 = vmatpush3.bf16.msra.mxu0 %v1860_v61 }
 0x121   : > { %1327 = vmatprep.subr.bf16.mxu1 %v1614_v0  ;;  %1402 = vmatprep.subr.bf16.mxu0 %v1614_v0 }
 0x124   : > { %1329 = vmatpush3.bf16.msra.mxu1 %v1328_v59  ;;  %1404 = vmatpush3.bf16.msra.mxu0 %v1874_v7 }
 0x125   : > { %1330 = vmatprep.subr.bf16.mxu1 %v1614_v0  ;;  %1405 = vmatprep.subr.bf16.mxu0 %v1614_v0 }
 0x128   : > { %1332 = vmatpush3.bf16.msra.mxu1 %v1331_v63  ;;  %1407 = vmatpush3.bf16.msra.mxu0 %v1888_v19 }
 0x129   : > { %1333 = vmatprep.subr.bf16.mxu1 %v1614_v0 }
 0x12b   : > { %1262 = vmatmul.mubr.msk.f32.vlgmr.msra.gmra.mrb[0].mxu0 %vm179_vm1, %v1617_v58 }
 0x12c   : > { %1335 = vmatpush3.bf16.msra.mxu1 %v1334_v16 }
 0x12f   : > { %1157 = vmatmul.mubr.f32.vlgmr.msra.gmra.mrb[0].mxu1 %v1950_v6 }
 0x1fe   : > { %v835_v15 = vpop.f32.mrb[0].mxu0 }
 0x1ff   : > { %v1263_v22 = vpop.f32.mrb[1].mxu0 }
 0x202   : > { %v540_v23 = vpop.f32.mrb[0].mxu1 }
 0x203   : > { %v1408_v24 = vadd.f32 %v835_v15, %v540_v23  ;;  %v1158_v0 = vpop.f32.mrb[1].mxu1 }
 0x205   : > { %839 = vst [vmem:[%s173_s17] sm:$0xff] %v1408_v24 }
 0x206   : > { %1551 = shalt.err (!%p1548_p7)
}
 0x207   : > { %s1552_s6 = scalar_lea.hbm %s2046_s28, 128  ;;  %s1556_s24 = scalar_lea.hbm %s2092_s2, 256 }
 0x208   : > { %p1553_p9 = scmp.ne.s32.totalorder %s2046_s28, %s1552_s6  ;;  %p1557_p0 = scmp.lt.u32.totalorder %s2046_s28, %s2092_s2 }
 0x209   : > { %p1558_p11 = scmp.lt.u32.totalorder %s1556_s24, %s1552_s6  ;;  %p1560_p4 = scmp.lt.u32.totalorder %s1552_s6, %s2046_s28 }
 0x20a   : > { %p1554_p2 = pnand %p1553_p9, %p1725_p12 }
 0x20b   : > { %p1559_p1 = por %p1558_p11, %p1557_p0 }
 0x20c   : > { %p1555_p5 = pneg %p1554_p2 }
 0x20d   : > { %p1561_p6 = por %p1560_p4, %p1559_p1 }
 0x20f   : > { %p1562_p8 = pnand %p1561_p6, %p1555_p5 }
 0x211   : > { %1565 = shalt.err (!%p1562_p8)
}
 0x212   : > { %1423 = dma.vmem_to_hbm [thread:$0]  (%p1725_p12), %s2048_s27, 128, %s2046_s28, %s841_s30  }
 0x213 PF: > { %s866_s26 = sand.u32 1, %s1596_s9   ;;  %p2107_p10 = scmp.ne.s32.totalorder %s2097_s16, 0 }
 0x214   : > { %p2108_p13 = scmp.ge.s32.totalorder %s1608_s12, 2  ;;  %s867_s19 = scalar_lea.sflag [#allocation4], %s866_s26 }
 0x216   : > { %p1434_p3 = pnand %p2108_p13, %p2107_p10 }
 0x218   : > { %1591 = dma.done.wait (!%p1434_p3), %s867_s19, 128  }
 0x219   : > { %1593 = vsyncadd (!%p1434_p3), %s867_s19, 4294967168  ;;  %p16_p7 = scmp.ge.s32.totalorder %s1690_s21, 4   ;;  %s2109_s9 = smov %s1600_s10 }
 0x21a   : > { %s2110_s10 = smov %s1604_s11  ;;  %s2111_s11 = smov %s1721_s8 }
 0x21b   : > { %s2112_s12 = smov %s1690_s21  ;;  %18 = sbr.rel (!%p16_p7) target bundleno = 6 (0x6), region = 77 }
 0x222   :  { %872 = vsyncpa [#allocation3], 1 }
 0x223   :  { %874 = vsyncpa [#allocation3 + $0x1], 1 }
 0x224   :  { %875 = vsyncpa [#allocation6], 1 }
 0x225   :  { %876 = vsyncpa [#allocation4], 1 }
 0x226   :  { %878 = vsyncpa [#allocation4 + $0x1], 1 }

</bundles_post_ra>
